<compile_context>
chip_gen: v7x
topology: tpu7x:2x2x1
jax: 0.10.0
libtpu: 0.0.40
codegen_flags: <defaults>
</compile_context>

<pallas_src>
import functools

import jax
import jax.numpy as jnp
from jax.experimental import pallas as pl
from jax.experimental.pallas import tpu as pltpu

_LANE = 128     # lane width: output/N dims padded to a multiple of this
_K_ALIGN = 16   # bf16 sublane packing: K/in dims padded to a multiple of this
_B_ALIGN = 16   # batch padded to a multiple of this (bf16 sublane packing)


def _round_up(n, m):
    return ((n + m - 1) // m) * m


# ---------------------------------------------------------------------------
# Kernel: one grid step == one linear layer.
# ---------------------------------------------------------------------------
def _mlp_kernel(x_ref, w_ref, b_ref, o_ref, act_ref, *,
                num_layers, final_act, batch, in_features, store_width):
    """Layer-at-a-time fused MLP.

    x_ref   : (batch, in_features)  f32  -- unpadded input, consumed at step 0
    w_ref   : (K_pad, N_pad)        bf16 -- layer l weight (zero padded)
    b_ref   : (1, N_pad)            f32  -- layer l bias   (zero padded)
    o_ref   : (B_pad, N_pad)        f32  -- written on the last step only
    act_ref : (B_pad, K_pad)        bf16 -- activation carried across steps
    """
    l = pl.program_id(0)

    # Step 0: zero-fill the activation scratch (padded rows/cols MUST be
    # finite zeros so zero weight rows contribute exactly zero), then place
    # the unpadded input.
    @pl.when(l == 0)
    def _():
        act_ref[...] = jnp.zeros_like(act_ref)
        act_ref[:batch, :in_features] = x_ref[...].astype(act_ref.dtype)

    # bf16 x bf16 on the MXU, f32 accumulation; bias broadcasts over rows.
    acc = jnp.dot(act_ref[...], w_ref[...], preferred_element_type=jnp.float32)
    acc = acc + b_ref[...]

    # Hidden layers: ReLU and write back to the persistent bf16 scratch.
    # Columns >= store_width were zeroed at step 0 and never written, so the
    # "padded K columns are zero" invariant holds for every layer.
    @pl.when(l < num_layers - 1)
    def _():
        h = jnp.maximum(acc, 0.0)
        act_ref[:, :store_width] = h[:, :store_width].astype(act_ref.dtype)

    # Last layer: optional final ReLU, single lane-dense f32 store.
    @pl.when(l == num_layers - 1)
    def _():
        out = jnp.maximum(acc, 0.0) if final_act else acc
        o_ref[...] = out.astype(o_ref.dtype)


# ---------------------------------------------------------------------------
# Wrapper
# ---------------------------------------------------------------------------
def mlp_forward(x, w_stacked, b_stacked, *, num_classes, final_act=False):
    """Run the fused MLP kernel.

    x         : (batch, in_features) f32, unpadded
    w_stacked : (L, K_pad, N_pad) bf16, zero padded, layout (in, out)
    b_stacked : (L, 1, N_pad) f32, zero padded
    """
    batch, in_features = x.shape
    num_layers, k_pad, n_pad = w_stacked.shape
    b_pad = _round_up(max(batch, _B_ALIGN), _B_ALIGN)
    store_width = min(k_pad, n_pad)

    kernel = functools.partial(
        _mlp_kernel,
        num_layers=num_layers,
        final_act=bool(final_act),
        batch=batch,
        in_features=in_features,
        store_width=store_width,
    )

    out_p = pl.pallas_call(
        kernel,
        out_shape=jax.ShapeDtypeStruct((b_pad, n_pad), jnp.float32),
        grid=(num_layers,),
        in_specs=[
            # Unpadded input; same block every step -> stays VMEM-resident.
            pl.BlockSpec((batch, in_features), lambda l: (0, 0)),
            # Layer l weight / bias; default double-buffering overlaps the
            # next layer's weight DMA with this layer's matmul.
            pl.BlockSpec((None, k_pad, n_pad), lambda l: (l, 0, 0)),
            pl.BlockSpec((None, 1, n_pad), lambda l: (l, 0, 0)),
        ],
        out_specs=pl.BlockSpec((b_pad, n_pad), lambda l: (0, 0)),
        scratch_shapes=[pltpu.VMEM((b_pad, k_pad), jnp.bfloat16)],
        compiler_params=pltpu.CompilerParams(
            dimension_semantics=("arbitrary",)),
    )(x, w_stacked, b_stacked)

    # TODO(synk): in production keep the consumer in padded layout; this slice
    # only exists so the script returns the logical (batch, num_classes) shape.
    return out_p[:batch, :num_classes]


# ---------------------------------------------------------------------------
# Parameter init (matches PyTorch nn.Linear default U(-1/sqrt(fan_in), ...)),
# stored as (in, out), then stacked + padded + cast once at init time.
# ---------------------------------------------------------------------------
def init_mlp_params(key, input_size, hidden_size, num_classes, depth):
    sizes = [input_size] + [hidden_size] * (depth - 1) + [num_classes]
    params = []
    for i in range(len(sizes) - 1):
        fan_in, fan_out = sizes[i], sizes[i + 1]
        key, kw, kb = jax.random.split(key, 3)
        bound = 1.0 / float(fan_in) ** 0.5
        w = jax.random.uniform(kw, (fan_in, fan_out), jnp.float32, -bound, bound)
        b = jax.random.uniform(kb, (fan_out,), jnp.float32, -bound, bound)
        params.append((w, b))
    return params, sizes


def stack_params(params, sizes):
    """Stack layers into (L, K_pad, N_pad) bf16 weights / (L, 1, N_pad) f32 bias.

    K (in) dim padded only to a 16-multiple (bf16 sublane); N (out/lane) dim
    padded to a 128-multiple.  Padding is zeros, so results are exact.
    """
    num_layers = len(params)
    k_pad = _round_up(max(sizes[:-1]), _K_ALIGN)
    n_pad = _round_up(max(sizes[1:]), _LANE)
    w_stacked = jnp.zeros((num_layers, k_pad, n_pad), jnp.float32)
    b_stacked = jnp.zeros((num_layers, 1, n_pad), jnp.float32)
    for i, (w, b) in enumerate(params):
        w_stacked = w_stacked.at[i, : w.shape[0], : w.shape[1]].set(w)
        b_stacked = b_stacked.at[i, 0, : b.shape[0]].set(b)
    return w_stacked.astype(jnp.bfloat16), b_stacked


# Pure-JAX reference (f32) of the PyTorch forward, for correctness check.
def mlp_reference(x, params, final_act=False):
    h = x
    for w, b in params[:-1]:
        h = jnp.maximum(h @ w + b, 0.0)
    w, b = params[-1]
    h = h @ w + b
    return jnp.maximum(h, 0.0) if final_act else h


if __name__ == "__main__":
    key = jax.random.PRNGKey(0)

    batch = 8
    input_size = 32
    hidden_size = 32
    num_classes = 8
    depth = 3  # Linear(in,h) -> Linear(h,h) -> Linear(h,classes)

    key, kx, kp = jax.random.split(key, 3)
    x = jax.random.normal(kx, (batch, input_size), jnp.float32)
    params, sizes = init_mlp_params(kp, input_size, hidden_size, num_classes,
                                    depth)
    w_stacked, b_stacked = stack_params(params, sizes)

    fwd = jax.jit(functools.partial(
        mlp_forward, num_classes=num_classes, final_act=False))
    fwd_relu = jax.jit(functools.partial(
        mlp_forward, num_classes=num_classes, final_act=True))

    out = jax.block_until_ready(fwd(x, w_stacked, b_stacked))
    assert out.shape == (batch, num_classes)

    # Numerical check vs. f32 reference (bf16 weights/activations -> loose tol).
    ref = mlp_reference(x, params, final_act=False)
    max_err = float(jnp.max(jnp.abs(out - ref)))
    assert bool(jnp.allclose(out, ref, atol=5e-2, rtol=5e-2)), (
        f"mismatch vs reference: max abs err {max_err}")

    out_relu = jax.block_until_ready(fwd_relu(x, w_stacked, b_stacked))
    assert out_relu.shape == (batch, num_classes)
    assert bool(jnp.all(out_relu >= 0.0))
    ref_relu = mlp_reference(x, params, final_act=True)
    assert bool(jnp.allclose(out_relu, ref_relu, atol=5e-2, rtol=5e-2))

    print("KERNEL_OK")
</pallas_src>

<mosaic_0001>
module attributes {stable_mosaic.version = 11 : i64} {
  func.func @_mlp_kernel(%arg0: i32, %arg1: memref<8x32xf32, #tpu.memory_space<vmem>>, %arg2: memref<1x32x128xbf16, #tpu.memory_space<vmem>>, %arg3: memref<1x1x128xf32, #tpu.memory_space<vmem>>, %arg4: memref<16x128xf32, #tpu.memory_space<vmem>>, %arg5: memref<16x32xbf16, #tpu.memory_space<vmem>>) attributes {dimension_semantics = [#tpu.dimension_semantics<arbitrary>], iteration_bounds = array<i64: 3>, scalar_prefetch = 0 : i64, scratch_operands = 1 : i64, tpu.core_type = #tpu.core_type<tc>, window_params = [{pipeline_mode = #tpu.pipeline_mode<synchronous>, transform_indices = @transform_0, window_bounds = array<i64: 8, 32>}, {transform_indices = @transform_1, window_bounds = array<i64: 1, 32, 128>}, {transform_indices = @transform_2, window_bounds = array<i64: 1, 1, 128>}, {pipeline_mode = #tpu.pipeline_mode<synchronous>, transform_indices = @transform_3, window_bounds = array<i64: 16, 128>}]} {
    %c0_i32 = arith.constant 0 : i32
    %0 = arith.cmpi eq, %arg0, %c0_i32 : i32
    %1 = arith.extui %0 : i1 to i32
    %c0_i32_0 = arith.constant 0 : i32
    %2 = arith.cmpi ne, %1, %c0_i32_0 : i32
    scf.if %2 {
      %cst_11 = arith.constant 0.000000e+00 : bf16
      %17 = vector.broadcast %cst_11 : bf16 to vector<16x32xbf16>
      %c0_12 = arith.constant 0 : index
      %c0_13 = arith.constant 0 : index
      %18 = vector.load %arg5[%c0_12, %c0_13] : memref<16x32xbf16, #tpu.memory_space<vmem>>, vector<16x32xbf16>
      tpu.vector_store %arg5[%c0_12, %c0_13], %17 {strides = array<i32>} : memref<16x32xbf16, #tpu.memory_space<vmem>>, vector<16x32xbf16>,
      %c0_14 = arith.constant 0 : index
      %c0_15 = arith.constant 0 : index
      %19 = vector.load %arg1[%c0_14, %c0_15] : memref<8x32xf32, #tpu.memory_space<vmem>>, vector<8x32xf32>
      %20 = arith.truncf %19 : vector<8x32xf32> to vector<8x32xbf16>
      %c0_16 = arith.constant 0 : index
      %c0_17 = arith.constant 0 : index
      %21 = vector.load %arg5[%c0_16, %c0_17] : memref<16x32xbf16, #tpu.memory_space<vmem>>, vector<8x32xbf16>
      tpu.vector_store %arg5[%c0_16, %c0_17], %20 {strides = array<i32>} : memref<16x32xbf16, #tpu.memory_space<vmem>>, vector<8x32xbf16>,
    } else {
    }
    %c0 = arith.constant 0 : index
    %c0_1 = arith.constant 0 : index
    %3 = vector.load %arg5[%c0, %c0_1] : memref<16x32xbf16, #tpu.memory_space<vmem>>, vector<16x32xbf16>
    %c0_2 = arith.constant 0 : index
    %c0_3 = arith.constant 0 : index
    %c0_4 = arith.constant 0 : index
    %4 = vector.load %arg2[%c0_2, %c0_3, %c0_4] : memref<1x32x128xbf16, #tpu.memory_space<vmem>>, vector<1x32x128xbf16>
    %5 = vector.shape_cast %4 : vector<1x32x128xbf16> to vector<32x128xbf16>
    %cst = arith.constant dense<0.000000e+00> : vector<16x128xf32>
    %6 = tpu.matmul %3, %5, %cst {dimension_numbers = #tpu.dot_dimension_numbers<[1], [0], [0], [1], [0, 0, 1, 1], [], []>} : vector<16x32xbf16>, vector<32x128xbf16>, vector<16x128xf32> -> vector<16x128xf32>
    %c0_5 = arith.constant 0 : index
    %c0_6 = arith.constant 0 : index
    %c0_7 = arith.constant 0 : index
    %7 = vector.load %arg3[%c0_5, %c0_6, %c0_7] : memref<1x1x128xf32, #tpu.memory_space<vmem>>, vector<1x1x128xf32>
    %8 = vector.shape_cast %7 : vector<1x1x128xf32> to vector<1x128xf32>
    %9 = vector.broadcast %8 : vector<1x128xf32> to vector<16x128xf32>
    %10 = arith.addf %6, %9 : vector<16x128xf32>
    %c2_i32 = arith.constant 2 : i32
    %11 = arith.cmpi slt, %arg0, %c2_i32 : i32
    %12 = arith.extui %11 : i1 to i32
    %c0_i32_8 = arith.constant 0 : i32
    %13 = arith.cmpi ne, %12, %c0_i32_8 : i32
    scf.if %13 {
      %cst_11 = arith.constant 0.000000e+00 : f32
      %17 = vector.broadcast %cst_11 : f32 to vector<16x128xf32>
      %18 = arith.maximumf %10, %17 : vector<16x128xf32>
      %19 = vector.extract_strided_slice %18 {offsets = [0, 0], sizes = [16, 32], strides = [1, 1]} : vector<16x128xf32> to vector<16x32xf32>
      %20 = arith.truncf %19 : vector<16x32xf32> to vector<16x32xbf16>
      %c0_12 = arith.constant 0 : index
      %c0_13 = arith.constant 0 : index
      %21 = vector.load %arg5[%c0_12, %c0_13] : memref<16x32xbf16, #tpu.memory_space<vmem>>, vector<16x32xbf16>
      tpu.vector_store %arg5[%c0_12, %c0_13], %20 {strides = array<i32>} : memref<16x32xbf16, #tpu.memory_space<vmem>>, vector<16x32xbf16>,
    } else {
    }
    %c2_i32_9 = arith.constant 2 : i32
    %14 = arith.cmpi eq, %arg0, %c2_i32_9 : i32
    %15 = arith.extui %14 : i1 to i32
    %c0_i32_10 = arith.constant 0 : i32
    %16 = arith.cmpi ne, %15, %c0_i32_10 : i32
    scf.if %16 {
      %c0_11 = arith.constant 0 : index
      %c0_12 = arith.constant 0 : index
      %17 = vector.load %arg4[%c0_11, %c0_12] : memref<16x128xf32, #tpu.memory_space<vmem>>, vector<16x128xf32>
      tpu.vector_store %arg4[%c0_11, %c0_12], %10 {strides = array<i32>} : memref<16x128xf32, #tpu.memory_space<vmem>>, vector<16x128xf32>,
    } else {
    }
    return
  }
  func.func @transform_0(%arg0: i32) -> (i32, i32) {
    %c0_i32 = arith.constant 0 : i32
    %c0_i32_0 = arith.constant 0 : i32
    %c0_i32_1 = arith.constant 0 : i32
    return %c0_i32, %c0_i32_0 : i32, i32
  }
  func.func @transform_1(%arg0: i32) -> (i32, i32, i32) {
    %c0_i32 = arith.constant 0 : i32
    %c0_i32_0 = arith.constant 0 : i32
    %c0_i32_1 = arith.constant 0 : i32
    return %arg0, %c0_i32, %c0_i32_0 : i32, i32, i32
  }
  func.func @transform_2(%arg0: i32) -> (i32, i32, i32) {
    %c0_i32 = arith.constant 0 : i32
    %c0_i32_0 = arith.constant 0 : i32
    %c0_i32_1 = arith.constant 0 : i32
    return %arg0, %c0_i32, %c0_i32_0 : i32, i32, i32
  }
  func.func @transform_3(%arg0: i32) -> (i32, i32) {
    %c0_i32 = arith.constant 0 : i32
    %c0_i32_0 = arith.constant 0 : i32
    %c0_i32_1 = arith.constant 0 : i32
    return %c0_i32, %c0_i32_0 : i32, i32
  }
}

</mosaic_0001>

<bundles_post_ra>
// kernel: mlp_forward.1
= control target key start
LH: loop header
LB: loop body
LE: loop exit
PB: predicated region body
PF: predicated region fallthrough
CT: control target
= control target key end

     0   :  { %8 = vsyncpa [#allocation4], 0  ;;  %s729_s0 = inlined_call_operand.hbm [shape: f32[8,32], index: 0, kind: input, shape index: {}]   ;;  %s730_s1 = inlined_call_operand.hbm [shape: bf16[3,32,128], index: 1, kind: input, shape index: {}]   ;;  %s731_s2 = inlined_call_operand.vmem [shape: f32[3,1,128], index: 2, kind: input, shape index: {}]   ;;  %s732_s3 = inlined_call_operand.vmem [shape: f32[16,128], index: 3, kind: output, shape index: {}]  }
   0x1   :  { %9 = vsyncpa [#allocation6], 0 }
   0x2   :  { %11 = vsyncpa [#allocation6 + $0x1], 0  ;;  %s570_s12 = smov 0   ;;  %s572_s13 = smov 0  }
   0x3   :  { %s574_s14 = smov 0   ;;  %s576_s15 = smov 0  }
   0x4 LB: > { %s589_s16 = sadd.s32 4294967295, %s541_s15   ;;  %s592_s17 = sadd.s32 1, %s541_s15   ;;  %s541_s15 = sphi %s576_s15, %s751_s15   ;;  %s537_s14 = sphi %s574_s14, %s750_s14   ;;  %s533_s13 = sphi %s572_s13, %s749_s13   ;;  %s529_s12 = sphi %s570_s12, %s748_s12  }
   0x5   : > { %s42_s18 = ssub.s32 %s541_s15, %s592_s17  ;;  %s45_s19 = sadd.s32 1, %s537_s14 }
   0x6   : > { %p43_p0 = scmp.eq.s32.totalorder %s42_s18, 0  ;;  %p52_p1 = scmp.ne.s32.totalorder %s537_s14, %s533_s13 }
   0x7   : > { %p53_p2 = scmp.eq.s32.totalorder %s541_s15, 0  ;;  %p58_p3 = scmp.ne.s32.totalorder %s533_s13, %s529_s12 }
   0x8   : > { %s602_s20 = scalar_select %p43_p0, %s537_s14, %s45_s19  }
   0x9   : > { %p604_p4 = por %p53_p2, %p52_p1  ;;  %p733_p5 = scmp.eq.s32.totalorder %s589_s16, 0 }
   0xa   : > { %p358_p6 = scmp.ge.s32.totalorder %s541_s15, 1  ;;  %p116_p7 = scmp.lt.s32.totalorder %s541_s15, 4 }
   0xb   : > { %p613_p8 = por %p733_p5, %p58_p3  ;;  %s543_s24 = smov [#allocation3]  }
   0xc   : > { %p618_p10 = pnand %p358_p6, %p116_p7  ;;  %s129_s25 = sshll.u32 %s543_s24, 4  ;;  %s130_s25 = int_to_ptr.vmem [resolvable:$true] %s129_s25 }
   0xd   : > { %s738_s22 = scalar_select %p613_p8, 1, 0 }
   0xe   : > { %s739_s23 = scalar_select %p618_p10, 1, 0 }
   0xf   : > { %p394_p11 = pneg %p618_p10  ;;  %p403_p12 = scmp.lt.s32.totalorder %s541_s15, 3 }
  0x10   : > { %s140_s26 = sand.u32 1, %s537_s14   ;;  %s445_s5 = scalar_lea.hbm %s729_s0, 128 }
  0x11   : > { %p628_p13 = pnand %p394_p11, %p733_p5  ;;  %p634_p0 = pnand %p403_p12, %p604_p4 }
  0x12   : > { %s361_s29 = sshll.u32 %s140_s26, 4  ;;  %p446_p1 = scmp.ne.s32.totalorder %s729_s0, %s445_s5 }
  0x13   : > { %s741_s28 = scalar_select %p634_p0, 1, 0 }
  0x14   : > { %p447_p2 = pneg %p628_p13  ;;  %p452_p4 = scmp.lt.u32.totalorder %s445_s5, %s729_s0 }
  0x16   : > { %p448_p3 = pnand %p447_p2, %p446_p1 }
  0x18   : > { %p449_p6 = pneg %p448_p3 }
  0x1a   : > { %p454_p7 = pnand %p452_p4, %p449_p6 }
  0x1c   : > { %457 = shalt.err (!%p454_p7)
}
  0x1d   : > { %s458_s10 = scalar_lea.vmem %s130_s25, 128  ;;  %p466_p5 = scmp.lt.s32.totalorder %s130_s25, %s130_s25 }
  0x1e   : > { %p459_p11 = scmp.ne.s32.totalorder %s130_s25, %s458_s10  ;;  %p467_p8 = scmp.lt.s32.totalorder %s458_s10, %s458_s10 }
  0x20   : > { %p461_p12 = pnand %p459_p11, %p447_p2  ;;  %p468_p10 = por %p467_p8, %p466_p5 }
  0x22   : > { %p462_p9 = pneg %p461_p12 }
  0x24   : > { %p469_p0 = pnand %p468_p10, %p462_p9 }
  0x26   : > { %472 = shalt.err (!%p469_p0)
}
  0x27   : > { %397 = dma.hbm_to_vmem [thread:$0]  (!%p628_p13), %s729_s0, 128, %s130_s25, [#allocation4]  }
  0x28   : > { %s376_s18 = sshll.u32 %s541_s15, 8  ;;  %s144_s30 = scalar_lea.vmem [#allocation5], %s361_s29 }
  0x29   : > { %s658_s24 = scalar_lea.hbm %s730_s1, %s376_s18  ;;  %s151_s4 = sshll.u32 %s144_s30, 4  ;;  %s660_s4 = int_to_ptr.vmem [resolvable:$true] %s151_s4 }
  0x2a   : > { %s662_s27 = scalar_lea.sflag [#allocation6], %s140_s26  ;;  %s473_s5 = scalar_lea.hbm %s658_s24, 256 }
  0x2b   : > { %p474_p5 = scmp.ne.s32.totalorder %s658_s24, %s473_s5  ;;  %p742_p8 = scmp.ne.s32.totalorder %s741_s28, 0 }
  0x2c   : > { %s478_s6 = scalar_lea.hbm %s730_s1, 768  ;;  %p479_p0 = scmp.lt.u32.totalorder %s658_s24, %s730_s1 }
  0x2d   : > { %p475_p9 = pneg %p742_p8  ;;  %p480_p1 = scmp.lt.u32.totalorder %s478_s6, %s473_s5 }
  0x2e   : > { %p482_p3 = scmp.lt.u32.totalorder %s473_s5, %s658_s24 }
  0x2f   : > { %p476_p10 = pnand %p475_p9, %p474_p5  ;;  %p481_p2 = por %p480_p1, %p479_p0 }
  0x31   : > { %p477_p13 = pneg %p476_p10  ;;  %p483_p6 = por %p482_p3, %p481_p2 }
  0x33   : > { %p484_p4 = pnand %p483_p6, %p477_p13 }
  0x35   : > { %487 = shalt.err (!%p484_p4)
}
  0x36   : > { %s488_s26 = scalar_lea.vmem %s660_s4, 256  ;;  %s544_s29 = smov [#allocation5]  }
  0x37   : > { %p489_p7 = scmp.ne.s32.totalorder %s660_s4, %s488_s26  ;;  %s493_s9 = sshll.u32 %s544_s29, 4  ;;  %s494_s9 = int_to_ptr.vmem [resolvable:$false] %s493_s9 }
  0x38   : > { %s495_s10 = scalar_lea.vmem %s494_s9, 512  ;;  %p496_p5 = scmp.lt.s32.totalorder %s660_s4, %s494_s9 }
  0x39   : > { %p491_p11 = pnand %p489_p7, %p475_p9  ;;  %p497_p10 = scmp.lt.s32.totalorder %s495_s10, %s488_s26 }
  0x3b   : > { %p492_p12 = pneg %p491_p11  ;;  %p498_p0 = por %p497_p10, %p496_p5 }
  0x3d   : > { %p499_p1 = pnand %p498_p0, %p492_p12 }
  0x3f   : > { %502 = shalt.err (!%p499_p1)
}
  0x40   : > { %s545_s11 = smov 64   ;;  %s546_s12 = smov 4  }
  0x41   : > { %401 = dma.hbm_to_vmem [thread:$0]  (!%p742_p8), %s658_s24, 256, %s660_s4, %s662_s27, %s545_s11, %s545_s11, %s546_s12  }
  0x42   : > { %p743_p9 = scmp.ne.s32.totalorder %s739_s23, 0 }
  0x43   : > { %p744_p13 = scmp.eq.s32.totalorder (!%p743_p9), %s589_s16, 0 }
  0x44   : > { %169 = sbr.rel (%p743_p9) target bundleno = 329 (0x149), region = 32 }
  0x4b   : > { %520 = dma.done.wait (%p744_p13), [#allocation4], 128   ;;  %p745_p2 = pmov %p744_p13 }
  0x4c   : > { %s175_s18 = sand.u32 1, %s533_s13   ;;  %p746_p3 = scmp.ne.s32.totalorder %s738_s22, 0 }
  0x4d   : > { %522 = vsyncadd (%p745_p2), [#allocation4], 4294967168  ;;  %s366_s19 = sshll.u32 %s175_s18, 4  ;;  %s176_s21 = scalar_lea.sflag [#allocation6], %s175_s18 }
  0x4e   : > { %s179_s30 = scalar_lea.vmem [#allocation5], %s366_s19 }
  0x4f   : > { %524 = dma.done.wait (%p746_p3), %s176_s21, 256  }
  0x50   : > { %526 = vsyncadd (%p746_p3), %s176_s21, 4294967040  ;;  %p200_p8 = scmp.lt.s32.totalorder %s589_s16, 2  ;;  %p747_p6 = scmp.ne.s32.totalorder %s589_s16, 0 }
  0x51   : > { %vm208_vm0 = vcmask (!%p747_p6), 261120   ;;  %v210_v0 = vld [vmem:[#allocation3] sm:$0xff] (!%p747_p6)  ;;  %vm212_vm1 = vcmask (!%p747_p6), 257024   ;;  %v547_v1 = vmov (!%p747_p6), 0  }
  0x52   : > { %s201_s23 = scalar_select %p200_p8, %s589_s16, 2 }
  0x53   : > { %207 = sbr.rel (%p747_p6) target bundleno = 90 (0x5a), region = 44  ;;  %209 = vst.msk [vmem:[#allocation2] sm:$0xff] (!%p747_p6), %vm208_vm0, %v547_v1  ;;  %v211_v2 = vpack.c.bf16 (!%p747_p6), %v210_v0, %v210_v0 }
  0x54   : > { %s202_s4 = scalar_lea.vmem %s731_s2, %s201_s23 }
  0x55   : > { %213 = vst.msk [vmem:[#allocation2] sm:$0xf] (!%p747_p6), %vm212_vm1, %v211_v2 }
  0x5a PF: > { %v443_v3 = vld [vmem:[%s179_s30] sm:$0xff]   ;;  %v548_v4 = vmov 0.0   ;;  %v444_v5 = vld [vmem:[%s179_s30 + $0x8] sm:$0xff]   ;;  %vm549_vm2 = vmmov 0   ;;  %vm238_vm3 = vcmask 261120   ;;  %p372_p4 = scmp.ge.s32.totalorder %s589_s16, 2 }
  0x5b   : > { %380 = vmatprep.subr.bf16.mxu0 %v548_v4  ;;  %384 = vmatprep.mubr.msk.bf16.mxu0 %vm549_vm2, %v548_v4  ;;  %v368_v7 = vld [vmem:[%s202_s4] ss:$0 sm:$0xff] }
  0x5c   : > { %381 = vmatpush3.bf16.msra.mxu0 %v443_v3  ;;  %v214_v6 = vld [vmem:[#allocation2] sm:$0xff] }
  0x5d   : > { %382 = vmatprep.subr.bf16.mxu0 %v548_v4 }
  0x60   : > { %383 = vmatpush3.bf16.msra.mxu0 %v444_v5 }
  0x63   : > { %385 = vmatmul.mubr.msk.bf16.vlgmr.msra.gmra.mrb[0].mxu0 %vm238_vm3, %v214_v6 }
 0x133   : > { %286 = sbr.rel (%p372_p4) target bundleno = 320 (0x140), region = 48 }
 0x136   : > { %v276_v8 = vpop.f32.mrb[0].mxu0 }
 0x137   : > { %v277_v9 = vadd.f32 %v368_v7, %v276_v8  ;;  %v386_v10 = vpop.f32.mrb[1].mxu0 }
 0x138   : > { %v279_v11 = vpop.f32.mrb[2].mxu0 }
 0x139   : > { %v280_v12 = vadd.f32 %v368_v7, %v279_v11  ;;  %v387_v13 = vpop.f32.mrb[3].mxu0  ;;  %v287_v14 = vmax.f32 (!%p372_p4), %v277_v9, 0.0 }
 0x13b   : > { %v288_v15 = vmax.f32 %v280_v12, 0.0 }
 0x13d   : > { %v289_v16 = vpack.c.bf16 %v288_v15, %v287_v14 }
 0x13f   : > { %290 = vst.msk [vmem:[#allocation2] sm:$0xff] %vm238_vm3, %v289_v16 }
 0x140 PF: > { %p373_p7 = scmp.ne.s32.totalorder %s589_s16, 2 }
 0x141   : > { %295 = vst [vmem:[%s732_s3] sm:$0xff] (!%p373_p7), %v277_v9  ;;  %296 = vst [vmem:[%s732_s3 + $0x8] sm:$0xff] (!%p373_p7), %v280_v12 }
 0x142   : > { %294 = sbr.rel (%p373_p7) target bundleno = 329 (0x149), region = 52 }
 0x149 PF: > { %p14_p11 = scmp.ge.s32.totalorder %s592_s17, 5   ;;  %s748_s12 = smov %s533_s13 }
 0x14a   : > { %s749_s13 = smov %s537_s14  ;;  %s750_s14 = smov %s602_s20 }
 0x14b   : > { %s751_s15 = smov %s592_s17  ;;  %16 = sbr.rel (!%p14_p11) target bundleno = 4 (0x4), region = 88 }
 0x152   :  { %308 = vsyncpa [#allocation4], 1 }
 0x153   :  { %310 = vsyncpa [#allocation4 + $0x1], 1 }
 0x154   :  { %311 = vsyncpa [#allocation6], 1 }
 0x155   :  { %313 = vsyncpa [#allocation6 + $0x1], 1 }

</bundles_post_ra>
